<compile_context>
chip_gen: v6e
topology: v6e:2x2x1
jax: 0.10.0
libtpu: 0.0.40
codegen_flags: <defaults>
</compile_context>

<pallas_src>
import jax
import jax.numpy as jnp
from jax.experimental import pallas as pl
from jax.experimental.pallas import tpu as pltpu


def _matmul_kernel(w_ref, x_ref, o_ref):
    # w_ref: (Cout, Cin*K)   x_ref: (Cin*K, LT)   o_ref: (Cout, LT)
    o_ref[...] = jnp.dot(
        w_ref[...], x_ref[...], preferred_element_type=jnp.float32
    ).astype(o_ref.dtype)


def _pick_lane_tile(total_lanes: int, max_lanes: int = 2048) -> int:
    """Largest multiple-of-128 tile that divides total_lanes and is <= max_lanes."""
    blocks = total_lanes // 128
    best = 1
    for g in range(1, min(blocks, max_lanes // 128) + 1):
        if blocks % g == 0:
            best = g
    return 128 * best


def conv_transpose1d_pallas(x, weight, *, stride=1, padding=0, dilation=1):
    assert stride == 1 and padding == 0, "kernel implements stride=1, padding=0"
    N, Cin, L = x.shape
    Cin_w, Cout, K = weight.shape
    assert Cin == Cin_w
    L_out = (L - 1) * stride - 2 * padding + dilation * (K - 1) + 1
    pad = dilation * (K - 1)

    # ---- wrapper-side glue (one-time XLA ops) ------------------------------
    # Weight: pre-flip taps and flatten to a dense (Cout, Cin*K) slab so the
    # kernel never slices the tap axis or transposes.
    #   w_slab[co, ci*K + k] = weight[ci, co, K-1-k]
    w_slab = jnp.transpose(weight[:, :, ::-1], (1, 0, 2)).reshape(Cout, Cin * K)

    # Input: zero-pad and build the im2col slab
    #   xcol[n, ci*K + k, t] = x_pad[n, ci, t + dilation*k]
    # TODO(synk): for large L, build the halo/im2col in-kernel from L-tiles of
    # x instead of materializing the K-expanded slab in HBM.
    x_pad = jnp.pad(x, ((0, 0), (0, 0), (pad, pad)))
    cols = jnp.stack(
        [x_pad[:, :, dilation * k: dilation * k + L_out] for k in range(K)],
        axis=2,
    )  # (N, Cin, K, L_out)
    xcol = cols.reshape(N, Cin * K, L_out)

    # Lane-dense output: pad L_out up to a multiple of 128 and fold batch into
    # the lane axis so every store is an unmasked full-lane vst.
    Lp = pl.cdiv(L_out, 128) * 128
    xcol = jnp.pad(xcol, ((0, 0), (0, 0), (0, Lp - L_out)))        # (N, CinK, Lp)
    x_fold = jnp.transpose(xcol, (1, 0, 2)).reshape(Cin * K, N * Lp)

    total_lanes = N * Lp
    LT = _pick_lane_tile(total_lanes)
    n_tiles = total_lanes // LT

    flops = 2 * Cout * (Cin * K) * total_lanes
    bytes_accessed = 4 * (w_slab.size + x_fold.size + Cout * total_lanes)

    out_fold = pl.pallas_call(
        _matmul_kernel,
        out_shape=jax.ShapeDtypeStruct((Cout, total_lanes), x.dtype),
        grid_spec=pltpu.PrefetchScalarGridSpec(
            num_scalar_prefetch=0,
            grid=(n_tiles,),
            in_specs=[
                # Weight slab: constant index_map -> stays VMEM-resident.
                pl.BlockSpec((Cout, Cin * K), lambda i: (0, 0)),
                pl.BlockSpec((Cin * K, LT), lambda i: (0, i)),
            ],
            out_specs=pl.BlockSpec((Cout, LT), lambda i: (0, i)),
        ),
        compiler_params=pltpu.CompilerParams(
            dimension_semantics=("parallel",),
        ),
        cost_estimate=pl.CostEstimate(
            flops=flops, transcendentals=0, bytes_accessed=bytes_accessed
        ),
    )(w_slab, x_fold)

    # Unfold: (Cout, N*Lp) -> (N, Cout, L_out)
    out = jnp.transpose(out_fold.reshape(Cout, N, Lp), (1, 0, 2))[:, :, :L_out]
    return out


def _reference(x, weight, dilation):
    # scatter-add reference (pure JAX, different code path) for sanity check
    N, Cin, L = x.shape
    _, Cout, K = weight.shape
    L_out = L + dilation * (K - 1)
    out = jnp.zeros((N, Cout, L_out), jnp.float32)
    for k in range(K):
        contrib = jnp.einsum(
            "ncl,co->nol",
            x.astype(jnp.float32),
            weight[:, :, k].astype(jnp.float32),
        )
        out = out.at[:, :, dilation * k: dilation * k + L].add(contrib)
    return out.astype(x.dtype)


if __name__ == "__main__":
    # module hyperparameters
    in_channels, out_channels, kernel_size = 3, 64, 5
    stride, padding, dilation = 1, 0, 3

    # deterministic parameter init (shape matches nn.ConvTranspose1d.weight:
    # (in_channels, out_channels, kernel_size)); bias=False in the module.
    key = jax.random.PRNGKey(0)
    kx, kw = jax.random.split(key)
    bound = 1.0 / (in_channels * kernel_size) ** 0.5
    weight = jax.random.uniform(
        kw, (in_channels, out_channels, kernel_size),
        jnp.float32, minval=-bound, maxval=bound)

    # small input consistent with the module: (batch, in_channels, length)
    batch, length = 2, 16
    x = jax.random.normal(kx, (batch, in_channels, length), jnp.float32)

    y = conv_transpose1d_pallas(
        x, weight, stride=stride, padding=padding, dilation=dilation)
    y = jax.block_until_ready(y)

    y_ref = _reference(x, weight, dilation)
    assert y.shape == (batch, out_channels,
                       length + dilation * (kernel_size - 1))
    assert jnp.allclose(y, y_ref, atol=1e-5, rtol=1e-5)

    print("KERNEL_OK")
</pallas_src>

<mosaic_0001>
module attributes {stable_mosaic.version = 11 : i64} {
  func.func @_matmul_kernel(%arg0: i32, %arg1: memref<64x15xf32, #tpu.memory_space<vmem>>, %arg2: memref<15x256xf32, #tpu.memory_space<vmem>>, %arg3: memref<64x256xf32, #tpu.memory_space<vmem>>) attributes {dimension_semantics = [#tpu.dimension_semantics<parallel>], iteration_bounds = array<i64: 1>, scalar_prefetch = 0 : i64, scratch_operands = 0 : i64, tpu.core_type = #tpu.core_type<tc>, window_params = [{pipeline_mode = #tpu.pipeline_mode<synchronous>, transform_indices = @transform_0, window_bounds = array<i64: 64, 15>}, {transform_indices = @transform_1, window_bounds = array<i64: 15, 256>}, {transform_indices = @transform_2, window_bounds = array<i64: 64, 256>}]} {
    %c0 = arith.constant 0 : index
    %c0_0 = arith.constant 0 : index
    %0 = vector.load %arg1[%c0, %c0_0] : memref<64x15xf32, #tpu.memory_space<vmem>>, vector<64x15xf32>
    %c0_1 = arith.constant 0 : index
    %c0_2 = arith.constant 0 : index
    %1 = vector.load %arg2[%c0_1, %c0_2] : memref<15x256xf32, #tpu.memory_space<vmem>>, vector<15x256xf32>
    %cst = arith.constant dense<0.000000e+00> : vector<64x256xf32>
    %2 = tpu.matmul %0, %1, %cst {dimension_numbers = #tpu.dot_dimension_numbers<[1], [0], [0], [1], [0, 0, 1, 1], [], []>} : vector<64x15xf32>, vector<15x256xf32>, vector<64x256xf32> -> vector<64x256xf32>
    %c0_3 = arith.constant 0 : index
    %c0_4 = arith.constant 0 : index
    %3 = vector.load %arg3[%c0_3, %c0_4] : memref<64x256xf32, #tpu.memory_space<vmem>>, vector<64x256xf32>
    tpu.vector_store %arg3[%c0_3, %c0_4], %2 {strides = array<i32>} : memref<64x256xf32, #tpu.memory_space<vmem>>, vector<64x256xf32>,
    return
  }
  func.func @transform_0(%arg0: i32) -> (i32, i32) {
    %c0_i32 = arith.constant 0 : i32
    %c0_i32_0 = arith.constant 0 : i32
    %c0_i32_1 = arith.constant 0 : i32
    return %c0_i32, %c0_i32_0 : i32, i32
  }
  func.func @transform_1(%arg0: i32) -> (i32, i32) {
    %c0_i32 = arith.constant 0 : i32
    %c0_i32_0 = arith.constant 0 : i32
    return %c0_i32, %arg0 : i32, i32
  }
  func.func @transform_2(%arg0: i32) -> (i32, i32) {
    %c0_i32 = arith.constant 0 : i32
    %c0_i32_0 = arith.constant 0 : i32
    return %c0_i32, %arg0 : i32, i32
  }
}

</mosaic_0001>

<bundles_post_ra>
// kernel: tpu_custom_call.1
= control target key start
LH: loop header
LB: loop body
LE: loop exit
PB: predicated region body
PF: predicated region fallthrough
CT: control target
= control target key end

     0   :  { %vm49_vm0 = vcmask 1046528   ;;  %vm24_vm1 = vcmask 121856   ;;  %s307_s0 = inlined_call_operand.vmem [shape: f32[64,15], index: 0, kind: input, shape index: {}]   ;;  %s308_s1 = inlined_call_operand.vmem [shape: f32[15,256], index: 1, kind: input, shape index: {}]   ;;  %s309_s2 = inlined_call_operand.hbm [shape: f32[64,256], index: 2, kind: output, shape index: {}]  }
   0x1   :  { %v23_v0 = vld [vmem:[%s308_s1 + $0x18] sm:$0x7f]  ;;  %v22_v1 = vld [vmem:[%s308_s1 + $0x10] sm:$0x7f]  ;;  %v21_v2 = vld [vmem:[%s308_s1 + $0x8] sm:$0xff] }
   0x2   :  { %201 = vmatprep.subr.msk.mxu0 %vm49_vm0, %v23_v0  ;;  %211 = vmatprep.subr.msk.mxu1 %vm49_vm0, %v23_v0  ;;  %v20_v3 = vld [vmem:[%s308_s1] sm:$0xff] }
   0x3   :  { %202 = vmatpush1.msk.msra.mxu0 %vm49_vm0, %v22_v1  ;;  %213 = vmatpush1.msk.msra.mxu1 %vm49_vm0, %v22_v1  ;;  %v12_v4 = vld [vmem:[%s307_s0] sm:$0xff] }
   0x4   :  { %86 = vmatprep.subr.mxu0 %v21_v2  ;;  %212 = vmatprep.subr.mxu1 %v21_v2  ;;  %v16_v5 = vld [vmem:[%s307_s0 + $0x20] sm:$0xff] }
   0x5   :  { %87 = vmatpush1.msra.mxu0 %v20_v3  ;;  %214 = vmatpush1.msra.mxu1 %v20_v3 }
   0x6   :  { %7 = vsyncpa [#allocation3], 0  ;;  %v241_v6 = vmov 0.0   ;;  %v13_v7 = vld [vmem:[%s307_s0 + $0x8] sm:$0xff]  ;;  %v14_v9 = vld [vmem:[%s307_s0 + $0x10] sm:$0xff] }
   0x7   :  { %120 = vmatprep.mubr.f32.mxu0 %v241_v6  ;;  %144 = vmatprep.mubr.f32.mxu1 %v241_v6  ;;  %v17_v8 = vld [vmem:[%s307_s0 + $0x28] sm:$0xff]  ;;  %v18_v10 = vld [vmem:[%s307_s0 + $0x30] sm:$0xff]  ;;  %v15_v11 = vld [vmem:[%s307_s0 + $0x18] sm:$0xff] }
   0x8   :  { %203 = vmatmul.mubr.msk.f32.vlgmr.msra.gmra.mxu0 %vm24_vm1, %v12_v4  ;;  %207 = vmatmul.mubr.msk.f32.vlgmr.msra.gmra.mxu1 %vm24_vm1, %v16_v5  ;;  %v19_v12 = vld [vmem:[%s307_s0 + $0x38] sm:$0xff]  ;;  %s242_s0 = smov [#allocation2]  }
   0x9   :  { %126 = vmatprep.mubr.f32.mxu0 %v241_v6  ;;  %150 = vmatprep.mubr.f32.mxu1 %v241_v6  ;;  %s190_s4 = sshll.u32 %s242_s0, 4  ;;  %s191_s4 = int_to_ptr.vmem [resolvable:$true] %s190_s4 }
   0xa   :  { %s219_s5 = scalar_lea.vmem %s191_s4, 2048  ;;  %p224_p1 = scmp.lt.s32.totalorder %s191_s4, %s191_s4 }
   0xb   :  { %p220_p0 = scmp.ne.s32.totalorder %s191_s4, %s219_s5  ;;  %p225_p2 = scmp.lt.s32.totalorder %s219_s5, %s219_s5 }
   0xc   :  { %204 = vmatmul.mubr.msk.f32.gmra.mxu0 %vm24_vm1, %v13_v7  ;;  %208 = vmatmul.mubr.msk.f32.gmra.mxu1 %vm24_vm1, %v17_v8 }
   0xd   :  { %132 = vmatprep.mubr.f32.mxu0 %v241_v6  ;;  %156 = vmatprep.mubr.f32.mxu1 %v241_v6  ;;  %p226_p3 = por %p225_p2, %p224_p1 }
   0xf   :  { %p227_p4 = pnand %p226_p3, %p220_p0 }
  0x10   :  { %205 = vmatmul.mubr.msk.f32.gmra.mxu0 %vm24_vm1, %v14_v9  ;;  %209 = vmatmul.mubr.msk.f32.gmra.mxu1 %vm24_vm1, %v18_v10 }
  0x11   :  { %138 = vmatprep.mubr.f32.mxu0 %v241_v6  ;;  %162 = vmatprep.mubr.f32.mxu1 %v241_v6 }
  0x14   :  { %206 = vmatmul.mubr.msk.f32.gmra.mxu0 %vm24_vm1, %v15_v11  ;;  %210 = vmatmul.mubr.msk.f32.gmra.mxu1 %vm24_vm1, %v19_v12 }
  0xc8   :  { %v122_v13 = vpop.f32.mrf.mxu0  ;;  %v146_v14 = vpop.f32.mrf.mxu1 }
  0xc9   :  { %169 = vst [vmem:[#allocation2] sm:$0xff] %v122_v13  ;;  %177 = vst [vmem:[#allocation2 + $0x40] sm:$0xff] %v146_v14 }
  0xca   :  { %v124_v15 = vpop.f32.mrf.mxu0  ;;  %v148_v16 = vpop.f32.mrf.mxu1 }
  0xcb   :  { %170 = vst [vmem:[#allocation2 + $0x8] sm:$0xff] %v124_v15  ;;  %178 = vst [vmem:[#allocation2 + $0x48] sm:$0xff] %v148_v16 }
  0xcc   :  { %v128_v17 = vpop.f32.mrf.mxu0  ;;  %v152_v18 = vpop.f32.mrf.mxu1 }
  0xcd   :  { %171 = vst [vmem:[#allocation2 + $0x10] sm:$0xff] %v128_v17  ;;  %179 = vst [vmem:[#allocation2 + $0x50] sm:$0xff] %v152_v18 }
  0xce   :  { %v130_v19 = vpop.f32.mrf.mxu0  ;;  %v154_v20 = vpop.f32.mrf.mxu1 }
  0xcf   :  { %172 = vst [vmem:[#allocation2 + $0x18] sm:$0xff] %v130_v19  ;;  %180 = vst [vmem:[#allocation2 + $0x58] sm:$0xff] %v154_v20 }
  0xd0   :  { %v134_v21 = vpop.f32.mrf.mxu0  ;;  %v158_v22 = vpop.f32.mrf.mxu1 }
  0xd1   :  { %173 = vst [vmem:[#allocation2 + $0x20] sm:$0xff] %v134_v21  ;;  %181 = vst [vmem:[#allocation2 + $0x60] sm:$0xff] %v158_v22 }
  0xd2   :  { %v136_v23 = vpop.f32.mrf.mxu0  ;;  %v160_v24 = vpop.f32.mrf.mxu1 }
  0xd3   :  { %174 = vst [vmem:[#allocation2 + $0x28] sm:$0xff] %v136_v23  ;;  %182 = vst [vmem:[#allocation2 + $0x68] sm:$0xff] %v160_v24 }
  0xd4   :  { %v140_v25 = vpop.f32.mrf.mxu0  ;;  %v164_v26 = vpop.f32.mrf.mxu1 }
  0xd5   :  { %175 = vst [vmem:[#allocation2 + $0x30] sm:$0xff] %v140_v25  ;;  %183 = vst [vmem:[#allocation2 + $0x70] sm:$0xff] %v164_v26 }
  0xd6   :  { %v142_v27 = vpop.f32.mrf.mxu0  ;;  %v166_v28 = vpop.f32.mrf.mxu1 }
  0xd7   :  { %176 = vst [vmem:[#allocation2 + $0x38] sm:$0xff] %v142_v27  ;;  %184 = vst [vmem:[#allocation2 + $0x78] sm:$0xff] %v166_v28 }
  0xd8   :  { %230 = shalt.err (!%p227_p4)
}
  0xd9   :  { %s243_s6 = smov 256   ;;  %s244_s7 = smov 16  }
  0xda   :  { %196 = dma.vmem_to_hbm [thread:$0]  %s191_s4, 2048, %s309_s2, [#allocation3], %s243_s6, %s243_s6, %s244_s7  }
  0xdb   :  { %239 = dma.done.wait [#allocation3], 2048  }
  0xdc   :  { %240 = vsyncadd [#allocation3], 4294965248 }
  0xdd   :  { %200 = vsyncpa [#allocation3], 1 }

</bundles_post_ra>
